<compile_context>
chip_gen: v5e
topology: v5e:2x2
jax: 0.10.0
libtpu: 0.0.40
codegen_flags: <defaults>
</compile_context>

<pallas_src>
import jax
import jax.numpy as jnp
from jax.experimental import pallas as pl
from jax.experimental.pallas import tpu as pltpu

_LANES = 512                           # lane-dense last dim (multiple of 128)
_SUBLANES = 8
_GROUP = _SUBLANES * _LANES            # elements per (8, 512) row-group
_TARGET_TILE_BYTES = 2 * 1024 * 1024   # per input, per pipeline buffer


def _l1_partial_kernel(x_ref, xd_ref, o_ref):
    # (G, 8, LANES) native-dtype tiles -> f32 on the VPU, |diff|, then a
    # VPU-only reduction over the leading (non sublane/lane) axis.
    diff = x_ref[...].astype(jnp.float32) - xd_ref[...].astype(jnp.float32)
    o_ref[...] = jnp.sum(jnp.abs(diff), axis=0, keepdims=True)


def _kl_kernel(zm_ref, zlv_ref, o_ref):
    zm = zm_ref[...].astype(jnp.float32)
    zlv = zlv_ref[...].astype(jnp.float32)
    o_ref[0, 0] = -0.5 * jnp.sum(1.0 + zlv - zm * zm - jnp.exp(zlv))


def _pad_reshape(a, padded_len, n_rows):
    flat = a.reshape(-1)
    pad = padded_len - flat.shape[0]
    if pad:
        flat = jnp.pad(flat, (0, pad))   # zeros on BOTH inputs -> |0-0| = 0
    return flat.reshape(n_rows, _SUBLANES, _LANES)


def vae_loss(x, x_decoded, z_mean, z_log_var, original_dim, alpha):
    """Pallas implementation of VAELoss.forward. Returns a scalar f32."""
    total = x.size
    itemsize = max(jnp.dtype(x.dtype).itemsize,
                   jnp.dtype(x_decoded.dtype).itemsize)

    n_groups = -(-total // _GROUP)                               # ceil-div
    groups_per_block = max(1, _TARGET_TILE_BYTES // (_GROUP * itemsize))
    groups_per_block = min(groups_per_block, n_groups)
    n_blocks = -(-n_groups // groups_per_block)
    n_rows = n_blocks * groups_per_block                         # padded row-groups
    padded_len = n_rows * _GROUP

    x3 = _pad_reshape(x, padded_len, n_rows)
    xd3 = _pad_reshape(x_decoded, padded_len, n_rows)

    blk = (groups_per_block, _SUBLANES, _LANES)
    partials = pl.pallas_call(
        _l1_partial_kernel,
        out_shape=jax.ShapeDtypeStruct((n_blocks, _SUBLANES, _LANES),
                                       jnp.float32),
        grid=(n_blocks,),
        in_specs=[pl.BlockSpec(blk, lambda i: (i, 0, 0)),
                  pl.BlockSpec(blk, lambda i: (i, 0, 0))],
        out_specs=pl.BlockSpec((1, _SUBLANES, _LANES), lambda i: (i, 0, 0)),
        compiler_params=pltpu.CompilerParams(
            dimension_semantics=("parallel",)),   # independent blocks -> megacore
    )(x3, xd3)

    kl = pl.pallas_call(
        _kl_kernel,
        out_shape=jax.ShapeDtypeStruct((1, 1), jnp.float32),
        in_specs=[pl.BlockSpec(memory_space=pltpu.MemorySpace.VMEM),
                  pl.BlockSpec(memory_space=pltpu.MemorySpace.VMEM)],
        out_specs=pl.BlockSpec(memory_space=pltpu.MemorySpace.SMEM),
    )(z_mean, z_log_var)[0, 0]

    rec_sum = jnp.sum(partials)           # tiny second-stage reduce (plain JAX)
    original_dim = jnp.asarray(original_dim, jnp.float32)
    alpha = jnp.asarray(alpha, jnp.float32)
    return original_dim * rec_sum + alpha * kl


if __name__ == "__main__":
    key = jax.random.PRNGKey(0)
    k1, k2, k3, k4 = jax.random.split(key, 4)

    B, C, H, W = 2, 4, 16, 16      # image-like inputs (NCHW convention)
    latent = 32

    x = jax.random.normal(k1, (B, C, H, W), jnp.float32)
    x_decoded = jax.random.normal(k2, (B, C, H, W), jnp.float32)
    z_mean = jax.random.normal(k3, (B, latent), jnp.float32)
    z_log_var = 0.1 * jax.random.normal(k4, (B, latent), jnp.float32)

    original_dim = C * H * W       # matches the usual VAE usage of this loss
    alpha = 0.5

    loss = vae_loss(x, x_decoded, z_mean, z_log_var, original_dim, alpha)
    loss = jax.block_until_ready(loss)

    # Pure-JAX reference check (same math as the PyTorch module).
    rec_ref = original_dim * jnp.sum(jnp.abs(x - x_decoded))
    kl_ref = -0.5 * jnp.sum(1.0 + z_log_var - z_mean**2 - jnp.exp(z_log_var))
    ref = rec_ref + alpha * kl_ref
    assert jnp.allclose(loss, ref, rtol=1e-5, atol=1e-3), (loss, ref)

    print("KERNEL_OK")
</pallas_src>

<mosaic_0001>
module attributes {stable_mosaic.version = 11 : i64} {
  func.func @_l1_partial_kernel(%arg0: i32, %arg1: memref<1x8x512xf32, #tpu.memory_space<vmem>>, %arg2: memref<1x8x512xf32, #tpu.memory_space<vmem>>, %arg3: memref<1x8x512xf32, #tpu.memory_space<vmem>>) attributes {dimension_semantics = [#tpu.dimension_semantics<parallel>], iteration_bounds = array<i64: 1>, scalar_prefetch = 0 : i64, scratch_operands = 0 : i64, tpu.core_type = #tpu.core_type<tc>, window_params = [{transform_indices = @transform_0, window_bounds = array<i64: 1, 8, 512>}, {transform_indices = @transform_1, window_bounds = array<i64: 1, 8, 512>}, {transform_indices = @transform_2, window_bounds = array<i64: 1, 8, 512>}]} {
    %c0 = arith.constant 0 : index
    %c0_0 = arith.constant 0 : index
    %c0_1 = arith.constant 0 : index
    %0 = vector.load %arg1[%c0, %c0_0, %c0_1] : memref<1x8x512xf32, #tpu.memory_space<vmem>>, vector<1x8x512xf32>
    %c0_2 = arith.constant 0 : index
    %c0_3 = arith.constant 0 : index
    %c0_4 = arith.constant 0 : index
    %1 = vector.load %arg2[%c0_2, %c0_3, %c0_4] : memref<1x8x512xf32, #tpu.memory_space<vmem>>, vector<1x8x512xf32>
    %2 = arith.subf %0, %1 : vector<1x8x512xf32>
    %3 = math.absf %2 : vector<1x8x512xf32>
    %cst = arith.constant dense<0.000000e+00> : vector<8x512xf32>
    %4 = vector.multi_reduction <add>, %3, %cst [0] : vector<1x8x512xf32> to vector<8x512xf32>
    %5 = vector.shape_cast %4 : vector<8x512xf32> to vector<1x8x512xf32>
    %c0_5 = arith.constant 0 : index
    %c0_6 = arith.constant 0 : index
    %c0_7 = arith.constant 0 : index
    %6 = vector.load %arg3[%c0_5, %c0_6, %c0_7] : memref<1x8x512xf32, #tpu.memory_space<vmem>>, vector<1x8x512xf32>
    tpu.vector_store %arg3[%c0_5, %c0_6, %c0_7], %5 {strides = array<i32>} : memref<1x8x512xf32, #tpu.memory_space<vmem>>, vector<1x8x512xf32>,
    return
  }
  func.func @transform_0(%arg0: i32) -> (i32, i32, i32) {
    %c0_i32 = arith.constant 0 : i32
    %c0_i32_0 = arith.constant 0 : i32
    %c0_i32_1 = arith.constant 0 : i32
    return %arg0, %c0_i32, %c0_i32_0 : i32, i32, i32
  }
  func.func @transform_1(%arg0: i32) -> (i32, i32, i32) {
    %c0_i32 = arith.constant 0 : i32
    %c0_i32_0 = arith.constant 0 : i32
    %c0_i32_1 = arith.constant 0 : i32
    return %arg0, %c0_i32, %c0_i32_0 : i32, i32, i32
  }
  func.func @transform_2(%arg0: i32) -> (i32, i32, i32) {
    %c0_i32 = arith.constant 0 : i32
    %c0_i32_0 = arith.constant 0 : i32
    %c0_i32_1 = arith.constant 0 : i32
    return %arg0, %c0_i32, %c0_i32_0 : i32, i32, i32
  }
}

</mosaic_0001>

<bundles_post_ra>
// kernel: tpu_custom_call.1
= control target key start
LH: loop header
LB: loop body
LE: loop exit
PB: predicated region body
PF: predicated region fallthrough
CT: control target
= control target key end

     0   :  { %7 = vsyncpa [#allocation3], 0  ;;  %s190_s0 = inlined_call_operand.hbm [shape: f32[1,8,512], index: 0, kind: input, shape index: {}]   ;;  %s191_s1 = inlined_call_operand.hbm [shape: f32[1,8,512], index: 1, kind: input, shape index: {}]   ;;  %s192_s2 = inlined_call_operand.hbm [shape: f32[1,8,512], index: 2, kind: output, shape index: {}]  }
   0x1   :  { %8 = vsyncpa [#allocation6], 0 }
   0x2   :  { %9 = vsyncpa [#allocation4], 0  ;;  %s15_s11 = sshll.u32 %s190_s0, 4  ;;  %s163_s12 = smov [#allocation2]   ;;  %s16_s11 = int_to_ptr.hbm [resolvable:$true] %s15_s11 }
   0x3   :  { %s17_s13 = sshll.u32 %s163_s12, 4  ;;  %s26_s16 = sshll.u32 %s191_s1, 4  ;;  %s18_s13 = int_to_ptr.vmem [resolvable:$true] %s17_s13  ;;  %s27_s16 = int_to_ptr.hbm [resolvable:$true] %s26_s16 }
   0x4   :  { %20 = dma.hbm_to_vmem [thread:$0]  %s16_s11, 512, %s18_s13, [#allocation3]  }
   0x5   :  { %s164_s17 = smov [#allocation5]  }
   0x6   :  { %s28_s18 = sshll.u32 %s164_s17, 4  ;;  %s29_s18 = int_to_ptr.vmem [resolvable:$true] %s28_s18 }
   0x7   :  { %31 = dma.hbm_to_vmem [thread:$0]  %s27_s16, 512, %s29_s18, [#allocation6]  }
   0x8   :  { %157 = dma.done.wait [#allocation3], 512  }
   0x9   :  { %158 = vsyncadd [#allocation3], 4294966784 }
   0xa   :  { %159 = dma.done.wait [#allocation6], 512  }
   0xb   :  { %160 = vsyncadd [#allocation6], 4294966784  ;;  %v40_v0 = vld [vmem:[#allocation2] sm:$0xff]  ;;  %v41_v2 = vld [vmem:[#allocation2 + $0x8] sm:$0xff]  ;;  %s165_s0 = smov [#allocation7]   ;;  %s71_s21 = sshll.u32 %s192_s2, 4  ;;  %s72_s21 = int_to_ptr.hbm [resolvable:$true] %s71_s21 }
   0xc   :  { %v44_v1 = vld [vmem:[#allocation5] sm:$0xff]  ;;  %v45_v4 = vld [vmem:[#allocation5 + $0x8] sm:$0xff]  ;;  %v42_v5 = vld [vmem:[#allocation2 + $0x10] sm:$0xff]  ;;  %s69_s1 = sshll.u32 %s165_s0, 4  ;;  %s70_s1 = int_to_ptr.vmem [resolvable:$true] %s69_s1 }
   0xd   :  { %v48_v3 = vsub.f32 %v40_v0, %v44_v1  ;;  %v46_v6 = vld [vmem:[#allocation5 + $0x10] sm:$0xff]  ;;  %v49_v7 = vsub.f32 %v41_v2, %v45_v4  ;;  %v43_v9 = vld [vmem:[#allocation2 + $0x18] sm:$0xff] }
   0xe   :  { %v50_v8 = vsub.f32 %v42_v5, %v46_v6  ;;  %v47_v10 = vld [vmem:[#allocation5 + $0x18] sm:$0xff] }
   0xf   :  { %v52_v11 = vand.u32 2147483647, %v48_v3  ;;  %v51_v12 = vsub.f32 %v43_v9, %v47_v10  ;;  %v53_v13 = vand.u32 2147483647, %v49_v7 }
  0x10   :  { %v54_v14 = vand.u32 2147483647, %v50_v8 }
  0x11   :  { %60 = vst [vmem:[#allocation7] sm:$0xff] %v52_v11  ;;  %v55_v15 = vand.u32 2147483647, %v51_v12 }
  0x12   :  { %61 = vst [vmem:[#allocation7 + $0x8] sm:$0xff] %v53_v13 }
  0x13   :  { %62 = vst [vmem:[#allocation7 + $0x10] sm:$0xff] %v54_v14 }
  0x14   :  { %63 = vst [vmem:[#allocation7 + $0x18] sm:$0xff] %v55_v15 }
  0x15   :  { %74 = dma.vmem_to_hbm [thread:$0]  %s70_s1, 512, %s72_s21, [#allocation4]  }
  0x16   :  { %161 = dma.done.wait [#allocation4], 512  }
  0x17   :  { %162 = vsyncadd [#allocation4], 4294966784 }
  0x18   :  { %79 = vsyncpa [#allocation3], 1 }
  0x19   :  { %80 = vsyncpa [#allocation6], 1 }
  0x1a   :  { %81 = vsyncpa [#allocation4], 1 }

</bundles_post_ra>
